<compile_context>
chip_gen: v6e
topology: v6e:2x2x1
jax: 0.10.0
libtpu: 0.0.40
codegen_flags: <defaults>
</compile_context>

<pallas_src>
import functools

import jax
import jax.numpy as jnp
from jax import lax
from jax.experimental import pallas as pl
from jax.experimental.pallas import tpu as pltpu


def _round_up(x, m):
    return (x + m - 1) // m * m


# --------------------------------------------------------------------------------------
# Kernel
# --------------------------------------------------------------------------------------
def _residual_block_kernel(*refs, K, pad, w_out, has_proj):
    if has_proj:
        p_ref, w1_ref, w2_ref, wsc_ref, sb_ref, o_ref, hp_ref = refs
    else:
        p_ref, w1_ref, w2_ref, sb_ref, o_ref, hp_ref = refs
        wsc_ref = None

    m, cp = o_ref.shape            # m = rows_per_tile * w_out (flattened), cp = padded channels
    rb = m // w_out

    sb = sb_ref[...]               # (8, cp) f32: s1, b1, s2, b2, ssc, bsc, 0, 0
    s1, b1 = sb[0:1, :], sb[1:2, :]
    s2, b2 = sb[2:3, :], sb[3:4, :]
    ssc, bsc = sb[4:5, :], sb[5:6, :]

    # ---- conv1: single bf16 MXU matmul, contraction = padded K*Cin (multiple of 128) ----
    p = p_ref[...]                                                   # (m, d1) bf16
    acc1 = jnp.dot(p, w1_ref[...], preferred_element_type=jnp.float32)

    # ---- bn1 + relu ----
    h = jnp.maximum(acc1 * s1 + b1, 0.0)                             # (m, cp) f32

    # ---- conv2: W-padded f32 VMEM scratch, K bf16 matmuls (contraction = cp) ----
    if pad > 0:
        hp_ref[:, :pad, :] = jnp.zeros((rb, pad, cp), jnp.float32)
        hp_ref[:, pad + w_out:, :] = jnp.zeros((rb, pad, cp), jnp.float32)
    hp_ref[:, pad:pad + w_out, :] = h.reshape(rb, w_out, cp)

    acc2 = jnp.zeros((m, cp), jnp.float32)
    for t in range(K):
        hs = hp_ref[:, t:t + w_out, :].reshape(m, cp).astype(jnp.bfloat16)
        acc2 = acc2 + jnp.dot(hs, w2_ref[t], preferred_element_type=jnp.float32)
    out2 = acc2 * s2 + b2

    # ---- shortcut ----
    if has_proj:
        sc = jnp.dot(p, wsc_ref[...], preferred_element_type=jnp.float32) * ssc + bsc
    else:
        # identity: lanes [0, Cout) of the first patch slab are x at the output positions;
        # ssc is zero on every padded lane, masking the other taps' data.
        sc = p[:, :cp].astype(jnp.float32) * ssc + bsc

    o_ref[...] = jnp.maximum(out2 + sc, 0.0)


# --------------------------------------------------------------------------------------
# Wrapper
# --------------------------------------------------------------------------------------
def _fold_bn(gamma, beta, mean, var, eps=1e-5):
    scale = gamma / jnp.sqrt(var + eps)
    bias = beta - mean * scale
    return scale, bias


def _pad_vec(v, cp):
    return jnp.pad(v.astype(jnp.float32), (0, cp - v.shape[0]))


def _pick_row_tile(R, w_out, cp, d1, pad):
    # rough per-(N*H)-row live VMEM bytes: double-buffered patches (bf16) and output (f32),
    # ~4 f32 intermediates, and the f32 conv2 scratch.
    per_row = (w_out * (2 * d1 * 2 + 2 * cp * 4 + 4 * cp * 4)
               + (w_out + 2 * pad) * cp * 4)
    budget = 10 * 1024 * 1024
    rb = (budget // max(per_row, 1)) // 8 * 8
    rb = max(8, min(rb, _round_up(R, 8)))
    return rb


def residual_block_2d(x_nchw, params, *, stride, kernel):
    """x_nchw: (N, Cin, H, W) float32 -> (N, Cout, H, Wout) float32."""
    K = kernel
    pad = K // 2
    N, Cin, H, W = x_nchw.shape
    Cout = params["w1"].shape[2]
    w_out = (W + 2 * pad - K) // stride + 1
    R = N * H
    has_proj = params["wsc"] is not None

    cp = _round_up(Cout, 128)            # lane-dense padded channel count
    d1 = _round_up(K * Cin, 128)         # conv1 contraction dim

    # ---- im2col in the wrapper (center tap first) + zero padding to 128 multiples ----
    tap_order = [pad] + [t for t in range(K) if t != pad]
    x_rwc = jnp.transpose(x_nchw, (0, 2, 3, 1)).reshape(R, W, Cin)
    x_p = jnp.pad(x_rwc, ((0, 0), (pad, pad), (0, 0)))
    cols = [x_p[:, t:t + stride * w_out:stride, :] for t in tap_order]
    patches = jnp.concatenate(cols, axis=-1)                         # (R, Wout, K*Cin)
    patches = jnp.pad(patches, ((0, 0), (0, 0), (0, d1 - K * Cin)))

    rb = _pick_row_tile(R, w_out, cp, d1, pad)
    R_pad = _round_up(R, rb)
    patches = jnp.pad(patches, ((0, R_pad - R), (0, 0), (0, 0)))
    patches = patches.reshape(R_pad * w_out, d1).astype(jnp.bfloat16)

    # ---- packed, channel-padded bf16 weights ----
    w1p = jnp.zeros((d1, cp), jnp.float32)
    for s, t in enumerate(tap_order):
        w1p = w1p.at[s * Cin:(s + 1) * Cin, :Cout].set(params["w1"][t])
    w1p = w1p.astype(jnp.bfloat16)

    w2p = (jnp.zeros((K, cp, cp), jnp.float32)
           .at[:, :Cout, :Cout].set(params["w2"]).astype(jnp.bfloat16))

    # ---- folded BN scale/bias packed into one (8, cp) f32 array ----
    s1, b1 = _fold_bn(params["g1"], params["be1"], params["m1"], params["v1"])
    s2, b2 = _fold_bn(params["g2"], params["be2"], params["m2"], params["v2"])
    if has_proj:
        ssc, bsc = _fold_bn(params["gsc"], params["besc"], params["msc"], params["vsc"])
    else:
        ssc = jnp.ones((Cout,), jnp.float32)
        bsc = jnp.zeros((Cout,), jnp.float32)
    sb = jnp.stack([_pad_vec(v, cp) for v in (s1, b1, s2, b2, ssc, bsc)]
                   + [jnp.zeros((cp,), jnp.float32)] * 2)

    mb = rb * w_out
    inputs = [patches, w1p, w2p]
    in_specs = [
        pl.BlockSpec((mb, d1), lambda i: (i, 0)),
        pl.BlockSpec((d1, cp), lambda i: (0, 0)),
        pl.BlockSpec((K, cp, cp), lambda i: (0, 0, 0)),
    ]
    if has_proj:
        wscp = (jnp.zeros((d1, cp), jnp.float32)
                .at[:Cin, :Cout].set(params["wsc"]).astype(jnp.bfloat16))
        inputs.append(wscp)
        in_specs.append(pl.BlockSpec((d1, cp), lambda i: (0, 0)))
    inputs.append(sb)
    in_specs.append(pl.BlockSpec((8, cp), lambda i: (0, 0)))

    kernel_fn = functools.partial(_residual_block_kernel,
                                  K=K, pad=pad, w_out=w_out, has_proj=has_proj)

    out = pl.pallas_call(
        kernel_fn,
        out_shape=jax.ShapeDtypeStruct((R_pad * w_out, cp), jnp.float32),
        grid_spec=pltpu.PrefetchScalarGridSpec(
            num_scalar_prefetch=0,
            grid=(R_pad // rb,),
            in_specs=in_specs,
            out_specs=pl.BlockSpec((mb, cp), lambda i: (i, 0)),
            scratch_shapes=[pltpu.VMEM((rb, w_out + 2 * pad, cp), jnp.float32)],
        ),
        compiler_params=pltpu.CompilerParams(
            dimension_semantics=("parallel",),
            vmem_limit_bytes=32 * 1024 * 1024,
        ),
    )(*inputs)

    out = out.reshape(R_pad, w_out, cp)[:R, :, :Cout].reshape(N, H, w_out, Cout)
    return jnp.transpose(out, (0, 3, 1, 2))


# --------------------------------------------------------------------------------------
# Pure-JAX reference (for correctness check)
# --------------------------------------------------------------------------------------
def _bn_ref(y, g, b, m, v, eps=1e-5):
    g = g.reshape(1, -1, 1, 1); b = b.reshape(1, -1, 1, 1)
    m = m.reshape(1, -1, 1, 1); v = v.reshape(1, -1, 1, 1)
    return (y - m) / jnp.sqrt(v + eps) * g + b


def residual_block_2d_ref(x, params, *, stride, kernel):
    K = kernel
    pad = K // 2
    dn = ("NCHW", "OIHW", "NCHW")
    w1 = jnp.transpose(params["w1"], (2, 1, 0))[:, :, None, :]   # (Cout,Cin,1,K)
    w2 = jnp.transpose(params["w2"], (2, 1, 0))[:, :, None, :]
    y = lax.conv_general_dilated(x, w1, (1, stride), ((0, 0), (pad, pad)),
                                 dimension_numbers=dn)
    y = jnp.maximum(_bn_ref(y, params["g1"], params["be1"], params["m1"], params["v1"]), 0.)
    y = lax.conv_general_dilated(y, w2, (1, 1), ((0, 0), (pad, pad)),
                                 dimension_numbers=dn)
    y = _bn_ref(y, params["g2"], params["be2"], params["m2"], params["v2"])
    if params["wsc"] is not None:
        wsc = jnp.transpose(params["wsc"], (1, 0))[:, :, None, None]
        sc = lax.conv_general_dilated(x, wsc, (1, stride), ((0, 0), (0, 0)),
                                      dimension_numbers=dn)
        sc = _bn_ref(sc, params["gsc"], params["besc"], params["msc"], params["vsc"])
    else:
        sc = x
    return jnp.maximum(y + sc, 0.)


def make_params(key, in_channels, out_channels, stride, kernel):
    ks = jax.random.split(key, 12)
    needs_proj = (stride != 1) or (in_channels != out_channels)
    p = {
        "w1": 0.1 * jax.random.normal(ks[0], (kernel, in_channels, out_channels), jnp.float32),
        "w2": 0.1 * jax.random.normal(ks[1], (kernel, out_channels, out_channels), jnp.float32),
        "g1": 1.0 + 0.1 * jax.random.normal(ks[2], (out_channels,), jnp.float32),
        "be1": 0.1 * jax.random.normal(ks[3], (out_channels,), jnp.float32),
        "m1": 0.1 * jax.random.normal(ks[4], (out_channels,), jnp.float32),
        "v1": 1.0 + 0.1 * jax.random.uniform(ks[5], (out_channels,), jnp.float32),
        "g2": 1.0 + 0.1 * jax.random.normal(ks[6], (out_channels,), jnp.float32),
        "be2": 0.1 * jax.random.normal(ks[7], (out_channels,), jnp.float32),
        "m2": 0.1 * jax.random.normal(ks[8], (out_channels,), jnp.float32),
        "v2": 1.0 + 0.1 * jax.random.uniform(ks[9], (out_channels,), jnp.float32),
    }
    if needs_proj:
        p["wsc"] = 0.1 * jax.random.normal(ks[10], (in_channels, out_channels), jnp.float32)
        ksc = jax.random.split(ks[11], 4)
        p["gsc"] = 1.0 + 0.1 * jax.random.normal(ksc[0], (out_channels,), jnp.float32)
        p["besc"] = 0.1 * jax.random.normal(ksc[1], (out_channels,), jnp.float32)
        p["msc"] = 0.1 * jax.random.normal(ksc[2], (out_channels,), jnp.float32)
        p["vsc"] = 1.0 + 0.1 * jax.random.uniform(ksc[3], (out_channels,), jnp.float32)
    else:
        p["wsc"] = None
    return p


def _bf16_round_weights(p):
    # pre-round conv weights so the bf16 kernel and the f32 reference see identical operands
    q = dict(p)
    for k in ("w1", "w2", "wsc"):
        if q.get(k) is not None:
            q[k] = q[k].astype(jnp.bfloat16).astype(jnp.float32)
    return q


if __name__ == "__main__":
    key = jax.random.PRNGKey(0)
    kx, kp1, kp2 = jax.random.split(key, 3)

    # ---- case 1: projection shortcut (stride 2, Cin != Cout) ----
    N, Cin, H, W = 2, 4, 4, 16
    Cout, stride, kernel = 8, 2, 3
    x = jax.random.normal(kx, (N, Cin, H, W), jnp.float32)
    x = x.astype(jnp.bfloat16).astype(jnp.float32)
    params = _bf16_round_weights(make_params(kp1, Cin, Cout, stride, kernel))

    out = jax.block_until_ready(residual_block_2d(x, params, stride=stride, kernel=kernel))
    ref = residual_block_2d_ref(x, params, stride=stride, kernel=kernel)
    assert out.shape == ref.shape, (out.shape, ref.shape)
    assert jnp.allclose(out, ref, rtol=2e-2, atol=2e-2), \
        float(jnp.max(jnp.abs(out - ref)))

    # ---- case 2: identity shortcut (stride 1, Cin == Cout) ----
    C = 8
    x2 = jax.random.normal(kx, (N, C, H, W), jnp.float32)
    x2 = x2.astype(jnp.bfloat16).astype(jnp.float32)
    params2 = _bf16_round_weights(make_params(kp2, C, C, 1, kernel))

    out2 = jax.block_until_ready(residual_block_2d(x2, params2, stride=1, kernel=kernel))
    ref2 = residual_block_2d_ref(x2, params2, stride=1, kernel=kernel)
    assert out2.shape == ref2.shape, (out2.shape, ref2.shape)
    assert jnp.allclose(out2, ref2, rtol=2e-2, atol=2e-2), \
        float(jnp.max(jnp.abs(out2 - ref2)))

    print("KERNEL_OK")
</pallas_src>

<mosaic_0001>
module attributes {stable_mosaic.version = 11 : i64} {
  func.func @_residual_block_kernel(%arg0: i32, %arg1: memref<64x128xbf16, #tpu.memory_space<vmem>>, %arg2: memref<128x128xbf16, #tpu.memory_space<vmem>>, %arg3: memref<3x128x128xbf16, #tpu.memory_space<vmem>>, %arg4: memref<128x128xbf16, #tpu.memory_space<vmem>>, %arg5: memref<8x128xf32, #tpu.memory_space<vmem>>, %arg6: memref<64x128xf32, #tpu.memory_space<vmem>>, %arg7: memref<8x10x128xf32, #tpu.memory_space<vmem>>) attributes {dimension_semantics = [#tpu.dimension_semantics<parallel>], iteration_bounds = array<i64: 1>, scalar_prefetch = 0 : i64, scratch_operands = 1 : i64, tpu.core_type = #tpu.core_type<tc>, window_params = [{transform_indices = @transform_0, window_bounds = array<i64: 64, 128>}, {pipeline_mode = #tpu.pipeline_mode<synchronous>, transform_indices = @transform_1, window_bounds = array<i64: 128, 128>}, {pipeline_mode = #tpu.pipeline_mode<synchronous>, transform_indices = @transform_2, window_bounds = array<i64: 3, 128, 128>}, {pipeline_mode = #tpu.pipeline_mode<synchronous>, transform_indices = @transform_3, window_bounds = array<i64: 128, 128>}, {pipeline_mode = #tpu.pipeline_mode<synchronous>, transform_indices = @transform_4, window_bounds = array<i64: 8, 128>}, {transform_indices = @transform_5, window_bounds = array<i64: 64, 128>}]} {
    %c0 = arith.constant 0 : index
    %c0_0 = arith.constant 0 : index
    %0 = vector.load %arg5[%c0, %c0_0] : memref<8x128xf32, #tpu.memory_space<vmem>>, vector<8x128xf32>
    %1 = vector.extract_strided_slice %0 {offsets = [0, 0], sizes = [1, 128], strides = [1, 1]} : vector<8x128xf32> to vector<1x128xf32>
    %2 = vector.extract_strided_slice %0 {offsets = [1, 0], sizes = [1, 128], strides = [1, 1]} : vector<8x128xf32> to vector<1x128xf32>
    %3 = vector.extract_strided_slice %0 {offsets = [2, 0], sizes = [1, 128], strides = [1, 1]} : vector<8x128xf32> to vector<1x128xf32>
    %4 = vector.extract_strided_slice %0 {offsets = [3, 0], sizes = [1, 128], strides = [1, 1]} : vector<8x128xf32> to vector<1x128xf32>
    %5 = vector.extract_strided_slice %0 {offsets = [4, 0], sizes = [1, 128], strides = [1, 1]} : vector<8x128xf32> to vector<1x128xf32>
    %6 = vector.extract_strided_slice %0 {offsets = [5, 0], sizes = [1, 128], strides = [1, 1]} : vector<8x128xf32> to vector<1x128xf32>
    %c0_1 = arith.constant 0 : index
    %c0_2 = arith.constant 0 : index
    %7 = vector.load %arg1[%c0_1, %c0_2] : memref<64x128xbf16, #tpu.memory_space<vmem>>, vector<64x128xbf16>
    %c0_3 = arith.constant 0 : index
    %c0_4 = arith.constant 0 : index
    %8 = vector.load %arg2[%c0_3, %c0_4] : memref<128x128xbf16, #tpu.memory_space<vmem>>, vector<128x128xbf16>
    %cst = arith.constant dense<0.000000e+00> : vector<64x128xf32>
    %9 = tpu.matmul %7, %8, %cst {dimension_numbers = #tpu.dot_dimension_numbers<[1], [0], [0], [1], [0, 0, 1, 1], [], []>} : vector<64x128xbf16>, vector<128x128xbf16>, vector<64x128xf32> -> vector<64x128xf32>
    %10 = vector.broadcast %1 : vector<1x128xf32> to vector<64x128xf32>
    %11 = arith.mulf %9, %10 : vector<64x128xf32>
    %12 = vector.broadcast %2 : vector<1x128xf32> to vector<64x128xf32>
    %13 = arith.addf %11, %12 : vector<64x128xf32>
    %cst_5 = arith.constant 0.000000e+00 : f32
    %14 = vector.broadcast %cst_5 : f32 to vector<64x128xf32>
    %15 = arith.maximumf %13, %14 : vector<64x128xf32>
    %cst_6 = arith.constant 0.000000e+00 : f32
    %16 = vector.broadcast %cst_6 : f32 to vector<8x1x128xf32>
    %c0_7 = arith.constant 0 : index
    %c0_8 = arith.constant 0 : index
    %c0_9 = arith.constant 0 : index
    %17 = vector.load %arg7[%c0_7, %c0_8, %c0_9] : memref<8x10x128xf32, #tpu.memory_space<vmem>>, vector<8x1x128xf32>
    tpu.vector_store %arg7[%c0_7, %c0_8, %c0_9], %16 {strides = array<i32>} : memref<8x10x128xf32, #tpu.memory_space<vmem>>, vector<8x1x128xf32>,
    %cst_10 = arith.constant 0.000000e+00 : f32
    %18 = vector.broadcast %cst_10 : f32 to vector<8x1x128xf32>
    %c0_11 = arith.constant 0 : index
    %c9 = arith.constant 9 : index
    %c0_12 = arith.constant 0 : index
    %19 = vector.load %arg7[%c0_11, %c9, %c0_12] : memref<8x10x128xf32, #tpu.memory_space<vmem>>, vector<8x1x128xf32>
    tpu.vector_store %arg7[%c0_11, %c9, %c0_12], %18 {strides = array<i32>} : memref<8x10x128xf32, #tpu.memory_space<vmem>>, vector<8x1x128xf32>,
    %20 = vector.shape_cast %15 : vector<64x128xf32> to vector<8x8x128xf32>
    %c0_13 = arith.constant 0 : index
    %c1 = arith.constant 1 : index
    %c0_14 = arith.constant 0 : index
    %21 = vector.load %arg7[%c0_13, %c1, %c0_14] : memref<8x10x128xf32, #tpu.memory_space<vmem>>, vector<8x8x128xf32>
    tpu.vector_store %arg7[%c0_13, %c1, %c0_14], %20 {strides = array<i32>} : memref<8x10x128xf32, #tpu.memory_space<vmem>>, vector<8x8x128xf32>,
    %cst_15 = arith.constant 0.000000e+00 : f32
    %22 = vector.broadcast %cst_15 : f32 to vector<64x128xf32>
    %c0_16 = arith.constant 0 : index
    %c0_17 = arith.constant 0 : index
    %c0_18 = arith.constant 0 : index
    %23 = vector.load %arg7[%c0_16, %c0_17, %c0_18] : memref<8x10x128xf32, #tpu.memory_space<vmem>>, vector<8x8x128xf32>
    %24 = vector.shape_cast %23 : vector<8x8x128xf32> to vector<64x128xf32>
    %25 = arith.truncf %24 : vector<64x128xf32> to vector<64x128xbf16>
    %c0_19 = arith.constant 0 : index
    %c0_20 = arith.constant 0 : index
    %c0_21 = arith.constant 0 : index
    %26 = vector.load %arg3[%c0_19, %c0_20, %c0_21] : memref<3x128x128xbf16, #tpu.memory_space<vmem>>, vector<1x128x128xbf16>
    %27 = vector.shape_cast %26 : vector<1x128x128xbf16> to vector<128x128xbf16>
    %cst_22 = arith.constant dense<0.000000e+00> : vector<64x128xf32>
    %28 = tpu.matmul %25, %27, %cst_22 {dimension_numbers = #tpu.dot_dimension_numbers<[1], [0], [0], [1], [0, 0, 1, 1], [], []>} : vector<64x128xbf16>, vector<128x128xbf16>, vector<64x128xf32> -> vector<64x128xf32>
    %29 = arith.addf %22, %28 : vector<64x128xf32>
    %c0_23 = arith.constant 0 : index
    %c1_24 = arith.constant 1 : index
    %c0_25 = arith.constant 0 : index
    %30 = vector.load %arg7[%c0_23, %c1_24, %c0_25] : memref<8x10x128xf32, #tpu.memory_space<vmem>>, vector<8x8x128xf32>
    %31 = vector.shape_cast %30 : vector<8x8x128xf32> to vector<64x128xf32>
    %32 = arith.truncf %31 : vector<64x128xf32> to vector<64x128xbf16>
    %c1_26 = arith.constant 1 : index
    %c0_27 = arith.constant 0 : index
    %c0_28 = arith.constant 0 : index
    %33 = vector.load %arg3[%c1_26, %c0_27, %c0_28] : memref<3x128x128xbf16, #tpu.memory_space<vmem>>, vector<1x128x128xbf16>
    %34 = vector.shape_cast %33 : vector<1x128x128xbf16> to vector<128x128xbf16>
    %cst_29 = arith.constant dense<0.000000e+00> : vector<64x128xf32>
    %35 = tpu.matmul %32, %34, %cst_29 {dimension_numbers = #tpu.dot_dimension_numbers<[1], [0], [0], [1], [0, 0, 1, 1], [], []>} : vector<64x128xbf16>, vector<128x128xbf16>, vector<64x128xf32> -> vector<64x128xf32>
    %36 = arith.addf %29, %35 : vector<64x128xf32>
    %c0_30 = arith.constant 0 : index
    %c2 = arith.constant 2 : index
    %c0_31 = arith.constant 0 : index
    %37 = vector.load %arg7[%c0_30, %c2, %c0_31] : memref<8x10x128xf32, #tpu.memory_space<vmem>>, vector<8x8x128xf32>
    %38 = vector.shape_cast %37 : vector<8x8x128xf32> to vector<64x128xf32>
    %39 = arith.truncf %38 : vector<64x128xf32> to vector<64x128xbf16>
    %c2_32 = arith.constant 2 : index
    %c0_33 = arith.constant 0 : index
    %c0_34 = arith.constant 0 : index
    %40 = vector.load %arg3[%c2_32, %c0_33, %c0_34] : memref<3x128x128xbf16, #tpu.memory_space<vmem>>, vector<1x128x128xbf16>
    %41 = vector.shape_cast %40 : vector<1x128x128xbf16> to vector<128x128xbf16>
    %cst_35 = arith.constant dense<0.000000e+00> : vector<64x128xf32>
    %42 = tpu.matmul %39, %41, %cst_35 {dimension_numbers = #tpu.dot_dimension_numbers<[1], [0], [0], [1], [0, 0, 1, 1], [], []>} : vector<64x128xbf16>, vector<128x128xbf16>, vector<64x128xf32> -> vector<64x128xf32>
    %43 = arith.addf %36, %42 : vector<64x128xf32>
    %44 = vector.broadcast %3 : vector<1x128xf32> to vector<64x128xf32>
    %45 = arith.mulf %43, %44 : vector<64x128xf32>
    %46 = vector.broadcast %4 : vector<1x128xf32> to vector<64x128xf32>
    %47 = arith.addf %45, %46 : vector<64x128xf32>
    %c0_36 = arith.constant 0 : index
    %c0_37 = arith.constant 0 : index
    %48 = vector.load %arg4[%c0_36, %c0_37] : memref<128x128xbf16, #tpu.memory_space<vmem>>, vector<128x128xbf16>
    %cst_38 = arith.constant dense<0.000000e+00> : vector<64x128xf32>
    %49 = tpu.matmul %7, %48, %cst_38 {dimension_numbers = #tpu.dot_dimension_numbers<[1], [0], [0], [1], [0, 0, 1, 1], [], []>} : vector<64x128xbf16>, vector<128x128xbf16>, vector<64x128xf32> -> vector<64x128xf32>
    %50 = vector.broadcast %5 : vector<1x128xf32> to vector<64x128xf32>
    %51 = arith.mulf %49, %50 : vector<64x128xf32>
    %52 = vector.broadcast %6 : vector<1x128xf32> to vector<64x128xf32>
    %53 = arith.addf %51, %52 : vector<64x128xf32>
    %54 = arith.addf %47, %53 : vector<64x128xf32>
    %cst_39 = arith.constant 0.000000e+00 : f32
    %55 = vector.broadcast %cst_39 : f32 to vector<64x128xf32>
    %56 = arith.maximumf %54, %55 : vector<64x128xf32>
    %c0_40 = arith.constant 0 : index
    %c0_41 = arith.constant 0 : index
    %57 = vector.load %arg6[%c0_40, %c0_41] : memref<64x128xf32, #tpu.memory_space<vmem>>, vector<64x128xf32>
    tpu.vector_store %arg6[%c0_40, %c0_41], %56 {strides = array<i32>} : memref<64x128xf32, #tpu.memory_space<vmem>>, vector<64x128xf32>,
    return
  }
  func.func @transform_0(%arg0: i32) -> (i32, i32) {
    %c0_i32 = arith.constant 0 : i32
    %c0_i32_0 = arith.constant 0 : i32
    return %arg0, %c0_i32 : i32, i32
  }
  func.func @transform_1(%arg0: i32) -> (i32, i32) {
    %c0_i32 = arith.constant 0 : i32
    %c0_i32_0 = arith.constant 0 : i32
    %c0_i32_1 = arith.constant 0 : i32
    return %c0_i32, %c0_i32_0 : i32, i32
  }
  func.func @transform_2(%arg0: i32) -> (i32, i32, i32) {
    %c0_i32 = arith.constant 0 : i32
    %c0_i32_0 = arith.constant 0 : i32
    %c0_i32_1 = arith.constant 0 : i32
    %c0_i32_2 = arith.constant 0 : i32
    return %c0_i32, %c0_i32_0, %c0_i32_1 : i32, i32, i32
  }
  func.func @transform_3(%arg0: i32) -> (i32, i32) {
    %c0_i32 = arith.constant 0 : i32
    %c0_i32_0 = arith.constant 0 : i32
    %c0_i32_1 = arith.constant 0 : i32
    return %c0_i32, %c0_i32_0 : i32, i32
  }
  func.func @transform_4(%arg0: i32) -> (i32, i32) {
    %c0_i32 = arith.constant 0 : i32
    %c0_i32_0 = arith.constant 0 : i32
    %c0_i32_1 = arith.constant 0 : i32
    return %c0_i32, %c0_i32_0 : i32, i32
  }
  func.func @transform_5(%arg0: i32) -> (i32, i32) {
    %c0_i32 = arith.constant 0 : i32
    %c0_i32_0 = arith.constant 0 : i32
    return %arg0, %c0_i32 : i32, i32
  }
}

</mosaic_0001>

<bundles_post_ra>
// kernel: tpu_custom_call.1
= control target key start
LH: loop header
LB: loop body
LE: loop exit
PB: predicated region body
PF: predicated region fallthrough
CT: control target
= control target key end

     0   :  { %10 = vsyncpa [#allocation4], 0  ;;  %s1546_s0 = inlined_call_operand.hbm [shape: bf16[64,128], index: 0, kind: input, shape index: {}]   ;;  %s1547_s1 = inlined_call_operand.hbm [shape: bf16[128,128], index: 1, kind: input, shape index: {}]   ;;  %s1548_s2 = inlined_call_operand.hbm [shape: bf16[3,128,128], index: 2, kind: input, shape index: {}]   ;;  %s1549_s3 = inlined_call_operand.hbm [shape: bf16[128,128], index: 3, kind: input, shape index: {}]   ;;  %s1550_s4 = inlined_call_operand.hbm [shape: f32[8,128], index: 4, kind: input, shape index: {}]   ;;  %s1551_s5 = inlined_call_operand.hbm [shape: f32[64,128], index: 5, kind: output, shape index: {}]  }
   0x1   :  { %11 = vsyncpa [#allocation7], 0 }
   0x2   :  { %12 = vsyncpa [#allocation10], 0 }
   0x3   :  { %13 = vsyncpa [#allocation5], 0  ;;  %s1382_s18 = smov [#allocation6]   ;;  %s1383_s20 = smov [#allocation9]  }
   0x4   :  { %s31_s19 = sshll.u32 %s1382_s18, 4  ;;  %s55_s21 = sshll.u32 %s1383_s20, 4  ;;  %s32_s19 = int_to_ptr.vmem [resolvable:$true] %s31_s19  ;;  %s56_s21 = int_to_ptr.vmem [resolvable:$true] %s55_s21 }
   0x5   :  { %s1262_s22 = scalar_lea.vmem %s32_s19, 1024  ;;  %p1267_p1 = scmp.lt.s32.totalorder %s32_s19, %s32_s19 }
   0x6   :  { %p1263_p0 = scmp.ne.s32.totalorder %s32_s19, %s1262_s22  ;;  %p1268_p2 = scmp.lt.s32.totalorder %s1262_s22, %s1262_s22 }
   0x8   :  { %p1269_p3 = por %p1268_p2, %p1267_p1 }
   0xa   :  { %p1270_p4 = pnand %p1269_p3, %p1263_p0 }
   0xc   :  { %1273 = shalt.err (!%p1270_p4)
}
   0xd   :  { %s1384_s23 = smov 64   ;;  %s1385_s24 = smov 4  }
   0xe   :  { %37 = dma.hbm_to_vmem [thread:$0]  %s1547_s1, 1024, %s32_s19, [#allocation7], %s1384_s23, %s1384_s23, %s1385_s24  }
   0xf   :  { %s1282_s27 = scalar_lea.vmem %s56_s21, 1024  ;;  %p1287_p6 = scmp.lt.s32.totalorder %s56_s21, %s56_s21 }
  0x10   :  { %p1283_p5 = scmp.ne.s32.totalorder %s56_s21, %s1282_s27  ;;  %p1288_p7 = scmp.lt.s32.totalorder %s1282_s27, %s1282_s27 }
  0x12   :  { %p1289_p8 = por %p1288_p7, %p1287_p6 }
  0x14   :  { %p1290_p9 = pnand %p1289_p8, %p1283_p5 }
  0x16   :  { %1293 = shalt.err (!%p1290_p9)
}
  0x17   :  { %61 = dma.hbm_to_vmem [thread:$0]  %s1549_s3, 1024, %s56_s21, [#allocation10], %s1384_s23, %s1384_s23, %s1385_s24  }
  0x18   :  { %s1386_s30 = smov [#allocation3]   ;;  %s1387_s7 = smov [#allocation8]  }
  0x19   :  { %s19_s6 = sshll.u32 %s1386_s30, 4  ;;  %s43_s8 = sshll.u32 %s1387_s7, 4  ;;  %s20_s6 = int_to_ptr.vmem [resolvable:$true] %s19_s6  ;;  %s44_s8 = int_to_ptr.vmem [resolvable:$true] %s43_s8 }
  0x1a   :  { %s1302_s1 = scalar_lea.vmem %s20_s6, 512  ;;  %p1307_p11 = scmp.lt.s32.totalorder %s20_s6, %s20_s6 }
  0x1b   :  { %p1303_p10 = scmp.ne.s32.totalorder %s20_s6, %s1302_s1  ;;  %p1308_p12 = scmp.lt.s32.totalorder %s1302_s1, %s1302_s1 }
  0x1d   :  { %p1309_p13 = por %p1308_p12, %p1307_p11 }
  0x1f   :  { %p1310_p0 = pnand %p1309_p13, %p1303_p10 }
  0x21   :  { %1313 = shalt.err (!%p1310_p0)
}
  0x22   :  { %25 = dma.hbm_to_vmem [thread:$0]  %s1546_s0, 512, %s20_s6, [#allocation4], %s1384_s23, %s1384_s23, %s1385_s24  }
  0x23   :  { %s1322_s3 = scalar_lea.vmem %s44_s8, 3072  ;;  %p1327_p2 = scmp.lt.s32.totalorder %s44_s8, %s44_s8 }
  0x24   :  { %p1323_p1 = scmp.ne.s32.totalorder %s44_s8, %s1322_s3  ;;  %p1328_p3 = scmp.lt.s32.totalorder %s1322_s3, %s1322_s3 }
  0x26   :  { %p1329_p4 = por %p1328_p3, %p1327_p2 }
  0x28   :  { %p1330_p5 = pnand %p1329_p4, %p1323_p1 }
  0x2a   :  { %1333 = shalt.err (!%p1330_p5)
}
  0x2b   :  { %49 = dma.hbm_to_vmem [thread:$0]  %s1548_s2, 3072, %s44_s8, [#allocation7], %s1384_s23, %s1384_s23, %s1385_s24  }
  0x2c   :  { %s1388_s13 = smov [#allocation11]  }
  0x2d   :  { %s68_s14 = sshll.u32 %s1388_s13, 4  ;;  %s69_s14 = int_to_ptr.vmem [resolvable:$true] %s68_s14 }
  0x2e   :  { %s1342_s15 = scalar_lea.vmem %s69_s14, 128  ;;  %p1347_p7 = scmp.lt.s32.totalorder %s69_s14, %s69_s14 }
  0x2f   :  { %p1343_p6 = scmp.ne.s32.totalorder %s69_s14, %s1342_s15  ;;  %p1348_p8 = scmp.lt.s32.totalorder %s1342_s15, %s1342_s15 }
  0x31   :  { %p1349_p9 = por %p1348_p8, %p1347_p7 }
  0x33   :  { %p1350_p10 = pnand %p1349_p9, %p1343_p6 }
  0x35   :  { %1353 = shalt.err (!%p1350_p10)
}
  0x36   :  { %71 = dma.hbm_to_vmem [thread:$0]  %s1550_s4, 128, %s69_s14, [#allocation10]  }
  0x37   :  { %1374 = dma.done.wait [#allocation4], 512  }
  0x38   :  { %1375 = vsyncadd [#allocation4], 4294966784 }
  0x39   :  { %1376 = dma.done.wait [#allocation7], 4096  }
  0x3a   :  { %1377 = vsyncadd [#allocation7], 4294963200 }
  0x3b   :  { %1378 = dma.done.wait [#allocation10], 1152  }
  0x3c   :  { %1379 = vsyncadd [#allocation10], 4294966144  ;;  %v1210_v0 = vld [vmem:[#allocation6 + $0x38] sm:$0xff]   ;;  %v1211_v1 = vld [vmem:[#allocation6 + $0x30] sm:$0xff]   ;;  %v1389_v24 = vmov 0.0   ;;  %v250_v31 = vlaneseq  ;;  %s1390_s2 = smov [#allocation12]  }
  0x3d   :  { %1063 = vmatprep.subr.bf16.mxu0 %v1210_v0  ;;  %v1212_v2 = vld [vmem:[#allocation6 + $0x28] sm:$0xff]   ;;  %v1213_v3 = vld [vmem:[#allocation6 + $0x20] sm:$0xff]   ;;  %v1214_v5 = vld [vmem:[#allocation6 + $0x18] sm:$0xff]   ;;  %282 = vst [vmem:[#allocation2] sm:$0x1] %v1389_v24  ;;  %s945_s4 = sshll.u32 %s1390_s2, 4  ;;  %s946_s4 = int_to_ptr.vmem [resolvable:$true] %s945_s4 }
  0x3e   :  { %1064 = vmatpush3.bf16.msra.mxu0 %v1210_v0  ;;  %v1450_v4 = vld [vmem:[#allocation3] sm:$0xff]   ;;  %v1222_v6 = vld [vmem:[#allocation8 + $0x78] sm:$0xff]   ;;  %v1224_v7 = vld [vmem:[#allocation8 + $0x70] sm:$0xff]   ;;  %283 = vst [vmem:[#allocation2 + $0x10] sm:$0x1] %v1389_v24  ;;  %v1465_v32 = vshrl.u32 %v250_v31, 7  ;;  %p1359_p12 = scmp.lt.s32.totalorder %s946_s4, %s946_s4 }
  0x3f   :  { %1065 = vmatprep.subr.bf16.mxu0 %v1211_v1  ;;  %1079 = vmatprep.mubr.bf16.mxu0 %v1450_v4  ;;  %v1215_v8 = vld [vmem:[#allocation6 + $0x10] sm:$0xff]   ;;  %v1226_v9 = vld [vmem:[#allocation8 + $0x68] sm:$0xff]   ;;  %v1217_v11 = vld [vmem:[#allocation6] sm:$0xff]   ;;  %284 = vst [vmem:[#allocation2 + $0x20] sm:$0x1] %v1389_v24  ;;  %s1354_s17 = scalar_lea.vmem %s946_s4, 1024 }
  0x40   :  { %1087 = vmatprep.subr.bf16.mxu1 %v1222_v6  ;;  %v1216_v10 = vld [vmem:[#allocation6 + $0x8] sm:$0xff]   ;;  %v1223_v12 = vld [vmem:[#allocation8 + $0x38] sm:$0xff]   ;;  %v1455_v14 = vld [vmem:[#allocation3 + $0x10] sm:$0xff]   ;;  %285 = vst [vmem:[#allocation2 + $0x30] sm:$0x1] %v1389_v24  ;;  %v252_v33 = vsub.s32 0, %v1465_v32  ;;  %p1355_p11 = scmp.ne.s32.totalorder %s946_s4, %s1354_s17  ;;  %p1360_p13 = scmp.lt.s32.totalorder %s1354_s17, %s1354_s17 }
  0x41   :  { %1088 = vmatpush3.bf16.msra.mxu1 %v1222_v6  ;;  %v1453_v13 = vld [vmem:[#allocation3 + $0x8] sm:$0xff]   ;;  %v1225_v15 = vld [vmem:[#allocation8 + $0x30] sm:$0xff]   ;;  %v1459_v16 = vld [vmem:[#allocation3 + $0x18] sm:$0xff]   ;;  %286 = vst [vmem:[#allocation2 + $0x40] sm:$0x1] %v1389_v24  ;;  %v264_v35 = vsub.s32 1, %v1465_v32 }
  0x42   :  { %1066 = vmatpush3.bf16.msra.mxu0 %v1211_v1  ;;  %1089 = vmatprep.subr.bf16.mxu1 %v1224_v7  ;;  %v1228_v17 = vld [vmem:[#allocation8 + $0x60] sm:$0xff]   ;;  %v1227_v18 = vld [vmem:[#allocation8 + $0x28] sm:$0xff]   ;;  %v1230_v19 = vld [vmem:[#allocation8 + $0x58] sm:$0xff]   ;;  %287 = vst [vmem:[#allocation2 + $0x50] sm:$0x1] %v1389_v24  ;;  %p1361_p0 = por %p1360_p13, %p1359_p12 }
  0x43   :  { %1067 = vmatprep.subr.bf16.mxu0 %v1212_v2  ;;  %v1229_v20 = vld [vmem:[#allocation8 + $0x20] sm:$0xff]   ;;  %v1232_v21 = vld [vmem:[#allocation8 + $0x50] sm:$0xff]   ;;  %v1231_v22 = vld [vmem:[#allocation8 + $0x18] sm:$0xff]   ;;  %288 = vst [vmem:[#allocation2 + $0x60] sm:$0x1] %v1389_v24 }
  0x44   :  { %v1234_v23 = vld [vmem:[#allocation8 + $0x48] sm:$0xff]   ;;  %289 = vst [vmem:[#allocation2 + $0x70] sm:$0x1] %v1389_v24  ;;  %290 = vst [vmem:[#allocation2 + $0x9] sm:$0x1] %v1389_v24  ;;  %v1233_v25 = vld [vmem:[#allocation8 + $0x10] sm:$0xff]   ;;  %p1362_p1 = pnand %p1361_p0, %p1355_p11 }
  0x45   :  { %1090 = vmatpush3.bf16.msra.mxu1 %v1224_v7  ;;  %291 = vst [vmem:[#allocation2 + $0x19] sm:$0x1] %v1389_v24  ;;  %292 = vst [vmem:[#allocation2 + $0x29] sm:$0x1] %v1389_v24  ;;  %v1236_v26 = vld [vmem:[#allocation8 + $0x40] sm:$0xff]   ;;  %v1235_v27 = vld [vmem:[#allocation8 + $0x8] sm:$0xff]  }
  0x46   :  { %1068 = vmatpush3.bf16.msra.mxu0 %v1212_v2  ;;  %1091 = vmatprep.subr.bf16.mxu1 %v1226_v9  ;;  %293 = vst [vmem:[#allocation2 + $0x39] sm:$0x1] %v1389_v24  ;;  %294 = vst [vmem:[#allocation2 + $0x49] sm:$0x1] %v1389_v24  ;;  %v1238_v28 = vld [vmem:[#allocation8 + $0xb8] sm:$0xff]   ;;  %v1237_v29 = vld [vmem:[#allocation8] sm:$0xff]  }
  0x47   :  { %1069 = vmatprep.subr.bf16.mxu0 %v1213_v3  ;;  %295 = vst [vmem:[#allocation2 + $0x59] sm:$0x1] %v1389_v24  ;;  %296 = vst [vmem:[#allocation2 + $0x69] sm:$0x1] %v1389_v24  ;;  %v1462_v30 = vld [vmem:[#allocation9 + $0x38] sm:$0xff]   ;;  %v1468_v34 = vld [vmem:[#allocation11] sm:$0xff] }
  0x48   :  { %297 = vst [vmem:[#allocation2 + $0x79] sm:$0x1] %v1389_v24  ;;  %v253_v36 = vrot.slane %v1468_v34, %v252_v33  ;;  %v265_v37 = vrot.slane %v1468_v34, %v264_v35  ;;  %v1240_v2 = vld [vmem:[#allocation8 + $0xb0] sm:$0xff]   ;;  %v1246_v33 = vld [vmem:[#allocation8 + $0x98] sm:$0xff]  }
  0x49   :  { %1092 = vmatpush3.bf16.msra.mxu1 %v1226_v9  ;;  %v1242_v9 = vld [vmem:[#allocation8 + $0xa8] sm:$0xff]  }
  0x4a   :  { %1070 = vmatpush3.bf16.msra.mxu0 %v1213_v3  ;;  %1093 = vmatprep.subr.bf16.mxu1 %v1228_v17 }
  0x4b   :  { %1071 = vmatprep.subr.bf16.mxu0 %v1214_v5 }
  0x4d   :  { %1094 = vmatpush3.bf16.msra.mxu1 %v1228_v17 }
  0x4e   :  { %1072 = vmatpush3.bf16.msra.mxu0 %v1214_v5  ;;  %1095 = vmatprep.subr.bf16.mxu1 %v1230_v19 }
  0x4f   :  { %1073 = vmatprep.subr.bf16.mxu0 %v1215_v8 }
  0x51   :  { %1096 = vmatpush3.bf16.msra.mxu1 %v1230_v19 }
  0x52   :  { %1074 = vmatpush3.bf16.msra.mxu0 %v1215_v8  ;;  %1097 = vmatprep.subr.bf16.mxu1 %v1232_v21 }
  0x53   :  { %1075 = vmatprep.subr.bf16.mxu0 %v1216_v10 }
  0x55   :  { %1098 = vmatpush3.bf16.msra.mxu1 %v1232_v21 }
  0x56   :  { %1076 = vmatpush3.bf16.msra.mxu0 %v1216_v10  ;;  %1099 = vmatprep.subr.bf16.mxu1 %v1234_v23 }
  0x57   :  { %1077 = vmatprep.subr.bf16.mxu0 %v1217_v11 }
  0x59   :  { %1100 = vmatpush3.bf16.msra.mxu1 %v1234_v23  ;;  %v1473_v23 = vld [vmem:[#allocation9 + $0x30] sm:$0xff]  }
  0x5a   :  { %1078 = vmatpush3.bf16.msra.mxu0 %v1217_v11  ;;  %1101 = vmatprep.subr.bf16.mxu1 %v1236_v26 }
  0x5b   :  { %1111 = vmatprep.subr.bf16.mxu0 %v1223_v12 }
  0x5d   :  { %1080 = vmatmul.mubr.bf16.vlgmr.msra.gmra.mxu0 %v1453_v13  ;;  %1102 = vmatpush3.bf16.msra.mxu1 %v1236_v26 }
  0x5e   :  { %1083 = vmatprep.mubr.bf16.mxu0 %v1455_v14  ;;  %1112 = vmatpush3.bf16.msra.mxu0 %v1223_v12 }
  0x5f   :  { %1113 = vmatprep.subr.bf16.mxu0 %v1225_v15  ;;  %1135 = vmatprep.subr.bf16.mxu1 %v1238_v28 }
  0x62   :  { %1114 = vmatpush3.bf16.msra.mxu0 %v1225_v15 }
  0x63   :  { %1115 = vmatprep.subr.bf16.mxu0 %v1227_v18 }
  0x65   :  { %1084 = vmatmul.mubr.bf16.gmra.mxu0 %v1459_v16 }
  0x66   :  { %1116 = vmatpush3.bf16.msra.mxu0 %v1227_v18 }
  0x67   :  { %1117 = vmatprep.subr.bf16.mxu0 %v1229_v20 }
  0x6a   :  { %1118 = vmatpush3.bf16.msra.mxu0 %v1229_v20 }
  0x6b   :  { %1119 = vmatprep.subr.bf16.mxu0 %v1231_v22 }
  0x6e   :  { %1120 = vmatpush3.bf16.msra.mxu0 %v1231_v22 }
  0x6f   :  { %1121 = vmatprep.subr.bf16.mxu0 %v1233_v25 }
  0x72   :  { %1122 = vmatpush3.bf16.msra.mxu0 %v1233_v25  ;;  %v1244_v25 = vld [vmem:[#allocation8 + $0xa0] sm:$0xff]  }
  0x73   :  { %1123 = vmatprep.subr.bf16.mxu0 %v1235_v27 }
  0x76   :  { %1124 = vmatpush3.bf16.msra.mxu0 %v1235_v27  ;;  %v1243_v27 = vld [vmem:[#allocation9 + $0x28] sm:$0xff]  }
  0x77   :  { %1125 = vmatprep.subr.bf16.mxu0 %v1237_v29 }
  0x7a   :  { %1126 = vmatpush3.bf16.msra.mxu0 %v1237_v29 }
  0x7b   :  { %1159 = vmatprep.subr.bf16.mxu0 %v1462_v30 }
 0x11d   :  { %v1081_v38 = vpop.f32.mrf.mxu0 }
 0x11e   :  { %v256_v39 = vmul.f32 %v1081_v38, %v253_v36  ;;  %v1245_v38 = vld [vmem:[#allocation9 + $0x20] sm:$0xff]  }
 0x11f   :  { %v219_v40 = vpop.f32.mrf.mxu0 }
 0x120   :  { %v268_v41 = vadd.f32 %v265_v37, %v256_v39  ;;  %v254_v42 = vmul.f32 %v253_v36, %v219_v40  ;;  %v1248_v39 = vld [vmem:[#allocation8 + $0x90] sm:$0xff]   ;;  %v1247_v40 = vld [vmem:[#allocation9 + $0x18] sm:$0xff]  }
 0x121   :  { %v1082_v43 = vpop.f32.mrf.mxu0 }
 0x122   :  { %v276_v44 = vmax.f32 %v268_v41, 0.0  ;;  %v266_v45 = vadd.f32 %v265_v37, %v254_v42  ;;  %v257_v46 = vmul.f32 %v1082_v43, %v253_v36  ;;  %v1250_v41 = vld [vmem:[#allocation8 + $0x88] sm:$0xff]   ;;  %v1249_v42 = vld [vmem:[#allocation9 + $0x10] sm:$0xff]   ;;  %v1252_v43 = vld [vmem:[#allocation8 + $0x80] sm:$0xff]  }
 0x123   :  { %v222_v47 = vpop.f32.mrf.mxu0 }
 0x124   :  { %300 = vst [vmem:[#allocation2 + $0x21] sm:$0xff] %v276_v44  ;;  %v274_v48 = vmax.f32 %v266_v45, 0.0  ;;  %v269_v49 = vadd.f32 %v265_v37, %v257_v46  ;;  %v255_v50 = vmul.f32 %v253_v36, %v222_v47 }
 0x125   :  { %v1085_v51 = vpop.f32.mrf.mxu0 }
 0x126   :  { %298 = vst [vmem:[#allocation2 + $0x1] sm:$0xff] %v274_v48  ;;  %v277_v52 = vmax.f32 %v269_v49, 0.0  ;;  %v267_v53 = vadd.f32 %v265_v37, %v255_v50  ;;  %v260_v54 = vmul.f32 %v1085_v51, %v253_v36  ;;  %v1253_v49 = vld [vmem:[#allocation9] sm:$0xff]  }
 0x127   :  { %v235_v55 = vpop.f32.mrf.mxu0 }
 0x128   :  { %301 = vst [vmem:[#allocation2 + $0x31] sm:$0xff] %v277_v52  ;;  %v275_v56 = vmax.f32 %v267_v53, 0.0  ;;  %v272_v57 = vadd.f32 %v265_v37, %v260_v54  ;;  %v258_v58 = vmul.f32 %v253_v36, %v235_v55  ;;  %v343_v1 = vpack.c.bf16 %v277_v52, %v276_v44  ;;  %v1251_v44 = vld [vmem:[#allocation9 + $0x8] sm:$0xff]  }
 0x129   :  { %v1086_v59 = vpop.f32.mrf.mxu0 }
 0x12a   :  { %299 = vst [vmem:[#allocation2 + $0x11] sm:$0xff] %v275_v56  ;;  %v280_v60 = vmax.f32 %v272_v57, 0.0  ;;  %v270_v61 = vadd.f32 %v265_v37, %v258_v58  ;;  %v261_v62 = vmul.f32 %v1086_v59, %v253_v36  ;;  %v342_v63 = vpack.c.bf16 %v275_v56, %v274_v48 }
 0x12b   :  { %v238_v0 = vpop.f32.mrf.mxu0  ;;  %v308_v19 = vld [vmem:[#allocation2 + $0x20] sm:$0xff] }
 0x12c   :  { %304 = vst [vmem:[#allocation2 + $0x61] sm:$0xff] %v280_v60  ;;  %v278_v3 = vmax.f32 %v270_v61, 0.0  ;;  %v273_v5 = vadd.f32 %v265_v37, %v261_v62  ;;  %v259_v6 = vmul.f32 %v253_v36, %v238_v0  ;;  %1103 = vmatprep.mubr.bf16.mxu1 %v342_v63  ;;  %v591_v48 = vld [vmem:[#allocation2 + $0x22] sm:$0xff] }
 0x12d   :  { %1104 = vmatmul.mubr.bf16.vlgmr.msra.gmra.mxu1 %v343_v1  ;;  %v306_v12 = vld [vmem:[#allocation2] sm:$0xff]  ;;  %v741_v1 = vsub.s32 2, %v1465_v32 }
 0x12e   :  { %302 = vst [vmem:[#allocation2 + $0x41] sm:$0xff] %v278_v3  ;;  %v281_v7 = vmax.f32 %v273_v5, 0.0  ;;  %v271_v8 = vadd.f32 %v265_v37, %v259_v6  ;;  %1136 = vmatpush3.bf16.msra.mxu1 %v1238_v28  ;;  %v589_v24 = vld [vmem:[#allocation2 + $0x2] sm:$0xff] }
 0x12f   :  { %1137 = vmatprep.subr.bf16.mxu1 %v1240_v2  ;;  %v309_v11 = vld [vmem:[#allocation2 + $0x30] sm:$0xff] }
 0x130   :  { %305 = vst [vmem:[#allocation2 + $0x71] sm:$0xff] %v281_v7  ;;  %v279_v10 = vmax.f32 %v271_v8, 0.0  ;;  %v345_v17 = vpack.c.bf16 %v281_v7, %v280_v60  ;;  %v315_v22 = vpack.c.bf16 %v309_v11, %v308_v19  ;;  %v592_v45 = vld [vmem:[#allocation2 + $0x32] sm:$0xff]  ;;  %v906_v11 = vsub.s32 5, %v1465_v32 }
 0x131   :  { %v307_v15 = vld [vmem:[#allocation2 + $0x10] sm:$0xff] }
 0x132   :  { %303 = vst [vmem:[#allocation2 + $0x51] sm:$0xff] %v279_v10  ;;  %v314_v18 = vpack.c.bf16 %v307_v15, %v306_v12  ;;  %1138 = vmatpush3.bf16.msra.mxu1 %v1240_v2  ;;  %v344_v20 = vpack.c.bf16 %v279_v10, %v278_v3  ;;  %v590_v21 = vld [vmem:[#allocation2 + $0x12] sm:$0xff]  ;;  %v894_v3 = vsub.s32 4, %v1465_v32  ;;  %v753_v10 = vsub.s32 3, %v1465_v32 }
 0x133   :  { %1139 = vmatprep.subr.bf16.mxu1 %v1242_v9  ;;  %v597_v26 = vpack.c.bf16 %v590_v21, %v589_v24  ;;  %v312_v28 = vld [vmem:[#allocation2 + $0x60] sm:$0xff] }
 0x134   :  { %1127 = vmatprep.mubr.bf16.mxu0 %v314_v18  ;;  %1107 = vmatprep.mubr.bf16.mxu1 %v344_v20  ;;  %v595_v51 = vld [vmem:[#allocation2 + $0x62] sm:$0xff]  ;;  %v1500_v18 = vrot.slane %v1468_v34, %v894_v3  ;;  %v1504_v24 = vrot.slane %v1468_v34, %v753_v10 }
 0x135   :  { %1128 = vmatmul.mubr.bf16.vlgmr.msra.gmra.mxu0 %v315_v22  ;;  %1108 = vmatmul.mubr.bf16.gmra.mxu1 %v345_v17  ;;  %v310_v29 = vld [vmem:[#allocation2 + $0x40] sm:$0xff] }
 0x136   :  { %1160 = vmatpush3.bf16.msra.mxu0 %v1462_v30  ;;  %1140 = vmatpush3.bf16.msra.mxu1 %v1242_v9  ;;  %v593_v46 = vld [vmem:[#allocation2 + $0x42] sm:$0xff]  ;;  %v1495_v9 = vrot.slane %v1468_v34, %v741_v1 }
 0x137   :  { %1161 = vmatprep.subr.bf16.mxu0 %v1473_v23  ;;  %1151 = vmatprep.mubr.bf16.mxu1 %v597_v26  ;;  %v313_v31 = vld [vmem:[#allocation2 + $0x70] sm:$0xff] }
 0x138   :  { %1141 = vmatprep.subr.bf16.mxu1 %v1244_v25  ;;  %v317_v36 = vpack.c.bf16 %v313_v31, %v312_v28  ;;  %v596_v52 = vld [vmem:[#allocation2 + $0x72] sm:$0xff] }
 0x139   :  { %v311_v35 = vld [vmem:[#allocation2 + $0x50] sm:$0xff]  ;;  %v600_v53 = vpack.c.bf16 %v596_v52, %v595_v51 }
 0x13a   :  { %1162 = vmatpush3.bf16.msra.mxu0 %v1473_v23  ;;  %v316_v37 = vpack.c.bf16 %v311_v35, %v310_v29  ;;  %1142 = vmatpush3.bf16.msra.mxu1 %v1244_v25  ;;  %v594_v47 = vld [vmem:[#allocation2 + $0x52] sm:$0xff]  ;;  %v1507_v25 = vrot.slane %v1468_v34, %v906_v11 }
 0x13b   :  { %1163 = vmatprep.subr.bf16.mxu0 %v1243_v27  ;;  %1143 = vmatprep.subr.bf16.mxu1 %v1246_v33  ;;  %v599_v50 = vpack.c.bf16 %v594_v47, %v593_v46 }
 0x13c   :  { %1131 = vmatprep.mubr.bf16.mxu0 %v316_v37 }
 0x13d   :  { %1132 = vmatmul.mubr.bf16.gmra.mxu0 %v317_v36 }
 0x13e   :  { %1164 = vmatpush3.bf16.msra.mxu0 %v1243_v27  ;;  %1144 = vmatpush3.bf16.msra.mxu1 %v1246_v33 }
 0x13f   :  { %1165 = vmatprep.subr.bf16.mxu0 %v1245_v38  ;;  %1145 = vmatprep.subr.bf16.mxu1 %v1248_v39 }
 0x140   :  { %1175 = vmatprep.mubr.bf16.mxu0 %v1450_v4  ;;  %v598_v4 = vpack.c.bf16 %v592_v45, %v591_v48 }
 0x142   :  { %1166 = vmatpush3.bf16.msra.mxu0 %v1245_v38  ;;  %1146 = vmatpush3.bf16.msra.mxu1 %v1248_v39 }
 0x143   :  { %1167 = vmatprep.subr.bf16.mxu0 %v1247_v40  ;;  %1147 = vmatprep.subr.bf16.mxu1 %v1250_v41 }
 0x146   :  { %1168 = vmatpush3.bf16.msra.mxu0 %v1247_v40  ;;  %1148 = vmatpush3.bf16.msra.mxu1 %v1250_v41 }
 0x147   :  { %1169 = vmatprep.subr.bf16.mxu0 %v1249_v42  ;;  %1149 = vmatprep.subr.bf16.mxu1 %v1252_v43 }
 0x14a   :  { %1170 = vmatpush3.bf16.msra.mxu0 %v1249_v42  ;;  %1150 = vmatpush3.bf16.msra.mxu1 %v1252_v43 }
 0x14b   :  { %1171 = vmatprep.subr.bf16.mxu0 %v1251_v44  ;;  %1183 = vmatprep.subr.bf16.mxu1 %v1462_v30 }
 0x14d   :  { %1152 = vmatmul.mubr.bf16.vlgmr.msra.gmra.mxu1 %v598_v4 }
 0x14e   :  { %1172 = vmatpush3.bf16.msra.mxu0 %v1251_v44  ;;  %1155 = vmatprep.mubr.bf16.mxu1 %v599_v50 }
 0x14f   :  { %1173 = vmatprep.subr.bf16.mxu0 %v1253_v49  ;;  %1191 = vmatpush3.bf16.msra.mxu1 %v1462_v30 }
 0x150   :  { %1184 = vmatprep.subr.bf16.mxu1 %v1473_v23 }
 0x152   :  { %1174 = vmatpush3.bf16.msra.mxu0 %v1253_v49 }
 0x153   :  { %1192 = vmatpush3.bf16.msra.mxu1 %v1473_v23 }
 0x154   :  { %1185 = vmatprep.subr.bf16.mxu1 %v1243_v27 }
 0x155   :  { %1176 = vmatmul.mubr.bf16.vlgmr.msra.gmra.mxu0 %v1453_v13  ;;  %1156 = vmatmul.mubr.bf16.gmra.mxu1 %v600_v53 }
 0x156   :  { %1179 = vmatprep.mubr.bf16.mxu1 %v1455_v14 }
 0x157   :  { %1193 = vmatpush3.bf16.msra.mxu1 %v1243_v27 }
 0x158   :  { %1186 = vmatprep.subr.bf16.mxu1 %v1245_v38 }
 0x15b   :  { %1194 = vmatpush3.bf16.msra.mxu1 %v1245_v38 }
 0x15c   :  { %1187 = vmatprep.subr.bf16.mxu1 %v1247_v40 }
 0x15f   :  { %1195 = vmatpush3.bf16.msra.mxu1 %v1247_v40 }
 0x160   :  { %1188 = vmatprep.subr.bf16.mxu1 %v1249_v42 }
 0x163   :  { %1196 = vmatpush3.bf16.msra.mxu1 %v1249_v42 }
 0x164   :  { %1189 = vmatprep.subr.bf16.mxu1 %v1251_v44 }
 0x167   :  { %1197 = vmatpush3.bf16.msra.mxu1 %v1251_v44 }
 0x168   :  { %1190 = vmatprep.subr.bf16.mxu1 %v1253_v49 }
 0x16b   :  { %1198 = vmatpush3.bf16.msra.mxu1 %v1253_v49 }
 0x16e   :  { %1180 = vmatmul.mubr.bf16.vlgmr.msra.gmra.mxu1 %v1459_v16 }
 0x1ed   :  { %v1105_v30 = vpop.f32.mrf.mxu1 }
 0x1ef   :  { %v445_v54 = vpop.f32.mrf.mxu1 }
 0x1f1   :  { %v1106_v13 = vpop.f32.mrf.mxu1 }
 0x1f3   :  { %v448_v57 = vpop.f32.mrf.mxu1 }
 0x1f5   :  { %v1129_v55 = vpop.f32.mrf.mxu0  ;;  %v1486_v58 = vpop.f32.mrf.mxu1 }
 0x1f6   :  { %v567_v2 = vadd.f32 %v1129_v55, %v1105_v30 }
 0x1f7   :  { %v558_v56 = vpop.f32.mrf.mxu0  ;;  %v461_v60 = vpop.f32.mrf.mxu1 }
 0x1f8   :  { %v559_v5 = vadd.f32 %v558_v56, %v445_v54 }
 0x1f9   :  { %v1130_v14 = vpop.f32.mrf.mxu0  ;;  %v1488_v62 = vpop.f32.mrf.mxu1 }
 0x1fa   :  { %v570_v12 = vadd.f32 %v1130_v14, %v1106_v13 }
 0x1fb   :  { %v561_v59 = vpop.f32.mrf.mxu0  ;;  %v1490_v0 = vpop.f32.mrf.mxu1 }
 0x1fc   :  { %v562_v22 = vadd.f32 %v561_v59, %v448_v57 }
 0x1fd   :  { %v1133_v61 = vpop.f32.mrf.mxu0 }
 0x1fe   :  { %v583_v55 = vadd.f32 %v1133_v61, %v1486_v58 }
 0x1ff   :  { %v574_v63 = vpop.f32.mrf.mxu0 }
 0x200   :  { %v575_v13 = vadd.f32 %v574_v63, %v461_v60 }
 0x201   :  { %v1134_v6 = vpop.f32.mrf.mxu0 }
 0x202   :  { %v586_v14 = vadd.f32 %v1134_v6, %v1488_v62 }
 0x203   :  { %v577_v19 = vpop.f32.mrf.mxu0 }
 0x20d   :  { %v1153_v16 = vpop.f32.mrf.mxu1 }
 0x20e   :  { %v733_v8 = vadd.f32 %v1153_v16, %v567_v2  ;;  %v578_v2 = vadd.f32 %v577_v19, %v1490_v0 }
 0x20f   :  { %v700_v7 = vpop.f32.mrf.mxu1 }
 0x210   :  { %v731_v15 = vadd.f32 %v700_v7, %v559_v5  ;;  %v745_v23 = vmul.f32 %v1495_v9, %v733_v8 }
 0x211   :  { %v1154_v17 = vpop.f32.mrf.mxu1 }
 0x212   :  { %v734_v20 = vadd.f32 %v1154_v17, %v570_v12  ;;  %v743_v32 = vmul.f32 %v1495_v9, %v731_v15  ;;  %v757_v33 = vadd.f32 %v1504_v24, %v745_v23 }
 0x213   :  { %v703_v21 = vpop.f32.mrf.mxu1 }
 0x214   :  { %v732_v28 = vadd.f32 %v703_v21, %v562_v22  ;;  %v746_v29 = vmul.f32 %v1495_v9, %v734_v20  ;;  %v755_v37 = vadd.f32 %v1504_v24, %v743_v32 }
 0x215   :  { %v1177_v26 = vpop.f32.mrf.mxu0  ;;  %v1157_v52 = vpop.f32.mrf.mxu1 }
 0x216   :  { %v898_v27 = vmul.f32 %v1177_v26, %v1500_v18  ;;  %v744_v40 = vmul.f32 %v1495_v9, %v732_v28  ;;  %v758_v42 = vadd.f32 %v1504_v24, %v746_v29  ;;  %v737_v57 = vadd.f32 %v1157_v52, %v583_v55 }
 0x217   :  { %v861_v31 = vpop.f32.mrf.mxu0  ;;  %v716_v54 = vpop.f32.mrf.mxu1 }
 0x218   :  { %v910_v35 = vadd.f32 %v1507_v25, %v898_v27  ;;  %v896_v36 = vmul.f32 %v1500_v18, %v861_v31  ;;  %v756_v49 = vadd.f32 %v1504_v24, %v744_v40  ;;  %v735_v59 = vadd.f32 %v716_v54, %v575_v13 }
 0x219   :  { %v1178_v38 = vpop.f32.mrf.mxu0  ;;  %v1158_v56 = vpop.f32.mrf.mxu1  ;;  %v749_v3 = vmul.f32 %v1495_v9, %v737_v57 }
 0x21a   :  { %v918_v34 = vadd.f32 %v910_v35, %v757_v33  ;;  %v908_v39 = vadd.f32 %v1507_v25, %v896_v36  ;;  %v899_v41 = vmul.f32 %v1178_v38, %v1500_v18  ;;  %v738_v1 = vadd.f32 %v1158_v56, %v586_v14 }
 0x21b   :  { %v864_v43 = vpop.f32.mrf.mxu0  ;;  %v719_v16 = vpop.f32.mrf.mxu1  ;;  %v747_v5 = vmul.f32 %v1495_v9, %v735_v59  ;;  %v761_v61 = vadd.f32 %v1504_v24, %v749_v3 }
 0x21c   :  { %v926_v44 = vmax.f32 %v918_v34, 0.0  ;;  %v916_v45 = vadd.f32 %v908_v39, %v755_v37  ;;  %v911_v46 = vadd.f32 %v1507_v25, %v899_v41  ;;  %v897_v47 = vmul.f32 %v1500_v18, %v864_v43 }
 0x21d   :  { %v736_v8 = vadd.f32 %v719_v16, %v578_v2  ;;  %v750_v58 = vmul.f32 %v1495_v9, %v738_v1  ;;  %v759_v6 = vadd.f32 %v1504_v24, %v747_v5 }
 0x21e   :  { %934 = vst [vmem:[#allocation12 + $0x10] sm:$0xff] %v926_v44  ;;  %v924_v48 = vmax.f32 %v916_v45, 0.0  ;;  %v919_v4 = vadd.f32 %v911_v46, %v758_v42  ;;  %v909_v50 = vadd.f32 %v1507_v25, %v897_v47 }
 0x21f   :  { %v748_v11 = vmul.f32 %v1495_v9, %v736_v8  ;;  %v762_v19 = vadd.f32 %v1504_v24, %v750_v58 }
 0x220   :  { %932 = vst [vmem:[#allocation12] sm:$0xff] %v924_v48  ;;  %v927_v51 = vmax.f32 %v919_v4, 0.0  ;;  %v917_v53 = vadd.f32 %v909_v50, %v756_v49 }
 0x221   :  { %v760_v26 = vadd.f32 %v1504_v24, %v748_v11 }
 0x222   :  { %935 = vst [vmem:[#allocation12 + $0x18] sm:$0xff] %v927_v51  ;;  %v925_v30 = vmax.f32 %v917_v53, 0.0 }
 0x224   :  { %933 = vst [vmem:[#allocation12 + $0x8] sm:$0xff] %v925_v30 }
 0x22e   :  { %v1181_v7 = vpop.f32.mrf.mxu1 }
 0x22f   :  { %v902_v10 = vmul.f32 %v1181_v7, %v1500_v18 }
 0x230   :  { %v877_v60 = vpop.f32.mrf.mxu1 }
 0x231   :  { %v914_v62 = vadd.f32 %v1507_v25, %v902_v10  ;;  %v900_v63 = vmul.f32 %v1500_v18, %v877_v60 }
 0x232   :  { %v1182_v0 = vpop.f32.mrf.mxu1 }
 0x233   :  { %v922_v12 = vadd.f32 %v914_v62, %v761_v61  ;;  %v912_v15 = vadd.f32 %v1507_v25, %v900_v63  ;;  %v903_v17 = vmul.f32 %v1182_v0, %v1500_v18 }
 0x234   :  { %v880_v20 = vpop.f32.mrf.mxu1 }
 0x235   :  { %v930_v21 = vmax.f32 %v922_v12, 0.0  ;;  %v920_v22 = vadd.f32 %v912_v15, %v759_v6  ;;  %v915_v23 = vadd.f32 %v1507_v25, %v903_v17  ;;  %v901_v32 = vmul.f32 %v1500_v18, %v880_v20 }
 0x237   :  { %938 = vst [vmem:[#allocation12 + $0x30] sm:$0xff] %v930_v21  ;;  %v928_v27 = vmax.f32 %v920_v22, 0.0  ;;  %v923_v28 = vadd.f32 %v915_v23, %v762_v19  ;;  %v913_v9 = vadd.f32 %v1507_v25, %v901_v32 }
 0x239   :  { %936 = vst [vmem:[#allocation12 + $0x20] sm:$0xff] %v928_v27  ;;  %v931_v29 = vmax.f32 %v923_v28, 0.0  ;;  %v921_v31 = vadd.f32 %v913_v9, %v760_v26 }
 0x23b   :  { %939 = vst [vmem:[#allocation12 + $0x38] sm:$0xff] %v931_v29  ;;  %v929_v33 = vmax.f32 %v921_v31, 0.0 }
 0x23d   :  { %937 = vst [vmem:[#allocation12 + $0x28] sm:$0xff] %v929_v33 }
 0x23e   :  { %1365 = shalt.err (!%p1362_p1)
}
 0x23f   :  { %s1391_s18 = smov 128   ;;  %s1392_s19 = smov 8  }
 0x240   :  { %951 = dma.vmem_to_hbm [thread:$0]  %s946_s4, 1024, %s1551_s5, [#allocation5], %s1391_s18, %s1391_s18, %s1392_s19  }
 0x241   :  { %1380 = dma.done.wait [#allocation5], 1024  }
 0x242   :  { %1381 = vsyncadd [#allocation5], 4294966272 }
 0x243   :  { %955 = vsyncpa [#allocation4], 1 }
 0x244   :  { %956 = vsyncpa [#allocation7], 1 }
 0x245   :  { %957 = vsyncpa [#allocation10], 1 }
 0x246   :  { %958 = vsyncpa [#allocation5], 1 }

</bundles_post_ra>
